<compile_context>
chip_gen: v6e
topology: v6e:2x2x1
jax: 0.10.0
libtpu: 0.0.40
codegen_flags: <defaults>
</compile_context>

<pallas_src>
import functools
import math

import jax
import jax.numpy as jnp
from jax.experimental import pallas as pl
from jax.experimental.pallas import tpu as pltpu


def _round_up(x, m):
    return ((x + m - 1) // m) * m


# ----------------------------- Pallas kernel ------------------------------ #
def detect_decode_kernel(lv_ref, row0_ref, nx_ref, ny_ref,
                         x_ref, w_ref, c_ref, o_ref):
    # lv_ref/row0_ref/nx_ref/ny_ref: SMEM tile schedule (level, level-local row
    #   start, level nx, level ny); lv is only consumed by the index_maps.
    # x_ref: (tm, Cp)  flattened NHWC activations for one (level, row-block)
    # w_ref: (Cp, NP)  1x1 conv weight, lane-padded (NP = round_up(na*no, 128))
    # c_ref: (8,  NP)  per-column constants:
    #        row0 = quad (4*anchor*stride on wh cols), row1 = lin (2*stride on
    #        xy cols, 1 on conf cols), row2 = bias, row3 = stride on the x col,
    #        row4 = stride on the y col.  All rows are exactly 0 on padded
    #        lanes so padded lanes decode to exactly 0.
    # o_ref: (tm, NP)  decoded output (lane-dense, unmasked stores)
    del lv_ref
    t = pl.program_id(0)
    tm = o_ref.shape[0]

    acc = jnp.dot(x_ref[...], w_ref[...], preferred_element_type=jnp.float32)
    sig = jax.nn.sigmoid(acc + c_ref[2:3, :])

    # stride*(coord - 0.5) xy offset, rebuilt from the row index in-kernel
    # (replaces the full-width g_ref HBM input of v2).  Rows are ordered
    # (b, y, x) within a level, so x = row % nx and y = (row // nx) % ny.
    row0 = row0_ref[t]
    nxf = nx_ref[t].astype(jnp.float32)
    nyf = ny_ref[t].astype(jnp.float32)
    rows = (row0 + jax.lax.broadcasted_iota(jnp.int32, (tm, 1), 0)
            ).astype(jnp.float32)
    # rows are integral: the +0.5 keeps the quotient well away from integers so
    # floor is robust to division rounding.
    q = jnp.floor((rows + 0.5) / nxf)            # rows // nx  (= b*ny + y)
    gx = rows - q * nxf - 0.5                    # (rows % nx) - 0.5
    p = jnp.floor((q + 0.5) / nyf)               # q // ny
    gy = q - p * nyf - 0.5                       # (q % ny) - 0.5
    add = gx * c_ref[3:4, :] + gy * c_ref[4:5, :]

    quad = c_ref[0:1, :]
    lin = c_ref[1:2, :]
    o_ref[...] = (sig * (quad * sig + lin) + add).astype(o_ref.dtype)


# --------------------------- fused decode wrapper --------------------------- #
def yolo_detect_decode_fused(xs, weights, biases, anchors, strides, nc,
                             *, tm=128, mm_dtype=jnp.bfloat16):
    """Fused 1x1-conv + sigmoid + YOLO box decode for ALL levels in one call."""
    nl = len(xs)
    na = anchors.shape[1]
    no = nc + 5
    N = na * no
    NP = _round_up(N, 128)                       # lane-dense padded columns
    Cp = _round_up(max(int(x.shape[1]) for x in xs), 8)

    Ms = [int(x.shape[0]) * int(x.shape[2]) * int(x.shape[3]) for x in xs]
    tm = _round_up(min(tm, _round_up(max(Ms), 8)), 8)   # size tile to the data
    tiles_per_level = [(m + tm - 1) // tm for m in Ms]
    n_tiles = int(sum(tiles_per_level))

    # Per-column helpers (shared across levels).
    cols = jnp.arange(NP)
    valid = cols < N
    c_idx = jnp.where(valid, cols % no, no)      # padded cols never match below
    a_idx = jnp.clip(cols // no, 0, na - 1)
    f_x = (c_idx == 0).astype(jnp.float32)
    f_y = (c_idx == 1).astype(jnp.float32)
    f_w = (c_idx == 2).astype(jnp.float32)
    f_h = (c_idx == 3).astype(jnp.float32)
    f_conf = (valid & (c_idx >= 4)).astype(jnp.float32)

    x_stack, w_stack, c_stack = [], [], []
    tile_level, tile_row0, tile_nx, tile_ny = [], [], [], []
    for i, x in enumerate(xs):
        b, C, ny, nx = (int(d) for d in x.shape)
        M, Mp = Ms[i], tiles_per_level[i] * tm
        stride = float(strides[i])

        # activations: NCHW -> (M, Cp), rows ordered (b, y, x), zero padded.
        x2d = jnp.transpose(x, (0, 2, 3, 1)).reshape(M, C).astype(mm_dtype)
        x_stack.append(jnp.pad(x2d, ((0, Mp - M), (0, Cp - C))))

        # 1x1 conv weight (C, N) -> (Cp, NP)
        w_stack.append(jnp.pad(weights[i].astype(mm_dtype),
                               ((0, Cp - C), (0, NP - N))))

        # per-column constants (all exactly zero on padded lanes).
        anc = anchors[i].astype(jnp.float32) * stride            # (na, 2)
        quad = 4.0 * (anc[a_idx, 0] * f_w + anc[a_idx, 1] * f_h)
        lin = (2.0 * stride) * (f_x + f_y) + f_conf
        bias_p = jnp.pad(biases[i].astype(jnp.float32), (0, NP - N))
        consts = jnp.zeros((8, NP), jnp.float32)
        consts = consts.at[0].set(quad).at[1].set(lin).at[2].set(bias_p)
        consts = consts.at[3].set(stride * f_x).at[4].set(stride * f_y)
        c_stack.append(consts)

        for j in range(tiles_per_level[i]):
            tile_level.append(i)
            tile_row0.append(j * tm)
            tile_nx.append(nx)
            tile_ny.append(ny)

    x_full = jnp.concatenate(x_stack, axis=0)        # (n_tiles*tm, Cp)
    w_full = jnp.concatenate(w_stack, axis=0)        # (nl*Cp, NP)
    c_full = jnp.concatenate(c_stack, axis=0)        # (nl*8,  NP)
    tile_level = jnp.asarray(tile_level, dtype=jnp.int32)
    tile_row0 = jnp.asarray(tile_row0, dtype=jnp.int32)
    tile_nx = jnp.asarray(tile_nx, dtype=jnp.int32)
    tile_ny = jnp.asarray(tile_ny, dtype=jnp.int32)

    out = pl.pallas_call(
        detect_decode_kernel,
        out_shape=jax.ShapeDtypeStruct((n_tiles * tm, NP), jnp.float32),
        grid_spec=pltpu.PrefetchScalarGridSpec(
            num_scalar_prefetch=4,
            grid=(n_tiles,),
            in_specs=[
                pl.BlockSpec((tm, Cp), lambda t, lv, r0, nxr, nyr: (t, 0)),
                pl.BlockSpec((Cp, NP), lambda t, lv, r0, nxr, nyr: (lv[t], 0)),
                pl.BlockSpec((8, NP), lambda t, lv, r0, nxr, nyr: (lv[t], 0)),
            ],
            out_specs=pl.BlockSpec((tm, NP), lambda t, lv, r0, nxr, nyr: (t, 0)),
        ),
        compiler_params=pltpu.CompilerParams(
            dimension_semantics=("parallel",),    # v7x: 2 TCs split the tiles
        ),
    )(tile_level, tile_row0, tile_nx, tile_ny, x_full, w_full, c_full)

    # Slice off the row/lane padding and bring each level to (bs, na*ny*nx, no)
    # in (b, a, y, x) row order; this stays tiny and fuses under the jit.
    zs, row_off = [], 0
    for i, x in enumerate(xs):
        b, C, ny, nx = (int(d) for d in x.shape)
        y = out[row_off:row_off + Ms[i], :N].reshape(b, ny, nx, na, no)
        zs.append(jnp.transpose(y, (0, 3, 1, 2, 4)).reshape(b, na * ny * nx, no))
        row_off += tiles_per_level[i] * tm
    return jnp.concatenate(zs, axis=1)


# ------------------------------ pure-JAX ref ------------------------------- #
def ref_level_decode(x_nchw, w2d, bias, anchors_i, stride, na, no,
                     mm_dtype=jnp.float32):
    bs, C, ny, nx = x_nchw.shape
    out = jnp.einsum("bchw,cn->bhwn", x_nchw.astype(mm_dtype),
                     w2d.astype(mm_dtype),
                     preferred_element_type=jnp.float32) + bias
    out = out.reshape(bs, ny, nx, na, no).transpose(0, 3, 1, 2, 4)
    sig = jax.nn.sigmoid(out)
    yv, xv = jnp.meshgrid(
        jnp.arange(ny, dtype=jnp.float32),
        jnp.arange(nx, dtype=jnp.float32),
        indexing="ij",
    )
    grid = jnp.stack([xv, yv], -1) - 0.5
    xy = (sig[..., 0:2] * 2.0 + grid) * stride
    anchor_grid = (anchors_i * stride).reshape(1, na, 1, 1, 2)
    wh = (sig[..., 2:4] * 2.0) ** 2 * anchor_grid
    y = jnp.concatenate([xy, wh, sig[..., 4:]], -1)
    return y.reshape(bs, -1, no)


# ---------------------------- full forward pass ---------------------------- #
def yolo_detect_forward(xs, weights, biases, anchors, nms_key, *,
                        strides, nc, max_det=100, mm_dtype=jnp.bfloat16):
    """Replicates YOLODetect.forward + EfficientNMS_TRT stub."""
    z = yolo_detect_decode_fused(xs, weights, biases, anchors, strides, nc,
                                 mm_dtype=mm_dtype)
    boxes, conf = z[..., :4], z[..., 4:]
    scores = conf[..., 0:1] * conf[..., 1:]

    # TODO(synk): EfficientNMS_TRT is a TensorRT plugin stub whose PyTorch
    # "forward" just emits random placeholder tensors; reproduce that shape
    # contract deterministically here instead of real NMS.
    bs = boxes.shape[0]
    k0, k1, k2, k3 = jax.random.split(nms_key, 4)
    num_dets = jax.random.randint(k0, (bs, 1), 0, max_det, dtype=jnp.int32)
    det_boxes = jax.random.normal(k1, (bs, max_det, 4), dtype=jnp.float32)
    det_scores = jax.random.normal(k2, (bs, max_det), dtype=jnp.float32)
    det_classes = jax.random.randint(k3, (bs, max_det), 0, nc, dtype=jnp.int32)
    return (num_dets, det_boxes, det_scores, det_classes), z, boxes, scores


# ---------------------------------- main ----------------------------------- #
if __name__ == "__main__":
    key = jax.random.PRNGKey(0)

    # Small YOLO-like configuration.
    nc = 3                       # number of classes
    no = nc + 5
    anchors_list = [[10, 13, 16, 30, 33, 23],
                    [30, 61, 62, 45, 59, 119],
                    [116, 90, 156, 198, 373, 326]]
    nl = len(anchors_list)
    na = len(anchors_list[0]) // 2
    anchors = jnp.asarray(anchors_list, dtype=jnp.float32).reshape(nl, na, 2)
    strides = (8.0, 16.0, 32.0)

    bs = 2
    ch = (4, 8, 16)
    spatial = ((16, 16), (8, 8), (4, 4))
    N = na * no

    # Deterministic synthetic parameters and inputs.
    keys = jax.random.split(key, 1 + 3 * nl)
    xs, weights, biases = [], [], []
    for i in range(nl):
        kx, kw, kb = keys[1 + 3 * i], keys[2 + 3 * i], keys[3 + 3 * i]
        ny, nx = spatial[i]
        xs.append(jax.random.normal(kx, (bs, ch[i], ny, nx), dtype=jnp.float32))
        # PyTorch Conv2d weight is (N, C, 1, 1); we store it as (C, N).
        fan_in = ch[i]
        bound = 1.0 / math.sqrt(fan_in)
        weights.append(jax.random.uniform(kw, (ch[i], N), jnp.float32,
                                          minval=-bound, maxval=bound))
        biases.append(jax.random.uniform(kb, (N,), jnp.float32,
                                         minval=-bound, maxval=bound))

    # Full forward (default bf16 matmul inputs, f32 decode/output).
    fwd = jax.jit(functools.partial(yolo_detect_forward,
                                    strides=strides, nc=nc, max_det=100))
    (num_dets, det_boxes, det_scores, det_classes), z, boxes, scores = fwd(
        tuple(xs), tuple(weights), tuple(biases), anchors, keys[0])
    jax.block_until_ready((num_dets, det_boxes, det_scores, det_classes, z))

    # Pure-JAX references (f32 matmul and bf16-matmul variants).
    z_ref32 = jnp.concatenate(
        [ref_level_decode(xs[i], weights[i], biases[i], anchors[i],
                          float(strides[i]), na, no) for i in range(nl)],
        axis=1)
    z_ref_bf = jnp.concatenate(
        [ref_level_decode(xs[i], weights[i], biases[i], anchors[i],
                          float(strides[i]), na, no, mm_dtype=jnp.bfloat16)
         for i in range(nl)],
        axis=1)

    # Exact check of the fused decode with f32 matmul inputs.
    z32 = yolo_detect_decode_fused(tuple(xs), tuple(weights), tuple(biases),
                                   anchors, strides, nc,
                                   mm_dtype=jnp.float32)
    jax.block_until_ready(z32)

    assert z.shape == (bs, sum(na * h * w for (h, w) in spatial), no)
    assert jnp.allclose(z32, z_ref32, atol=1e-4, rtol=1e-4), \
        "f32 kernel/ref mismatch"
    assert jnp.allclose(z, z_ref_bf, atol=1e-2, rtol=5e-3), \
        "bf16 kernel/ref mismatch"
    assert num_dets.shape == (bs, 1) and det_boxes.shape == (bs, 100, 4)
    assert det_scores.shape == (bs, 100) and det_classes.shape == (bs, 100)

    print("KERNEL_OK")
</pallas_src>

<mosaic_0001>
module attributes {stable_mosaic.version = 11 : i64} {
  func.func @detect_decode_kernel(%arg0: i32, %arg1: memref<6xi32, #tpu.memory_space<smem>>, %arg2: memref<6xi32, #tpu.memory_space<smem>>, %arg3: memref<6xi32, #tpu.memory_space<smem>>, %arg4: memref<6xi32, #tpu.memory_space<smem>>, %arg5: memref<128x16xbf16, #tpu.memory_space<vmem>>, %arg6: memref<16x128xbf16, #tpu.memory_space<vmem>>, %arg7: memref<8x128xf32, #tpu.memory_space<vmem>>, %arg8: memref<128x128xf32, #tpu.memory_space<vmem>>) attributes {dimension_semantics = [#tpu.dimension_semantics<parallel>], iteration_bounds = array<i64: 6>, scalar_prefetch = 4 : i64, scratch_operands = 0 : i64, tpu.core_type = #tpu.core_type<tc>, window_params = [{transform_indices = @transform_0, window_bounds = array<i64: 128, 16>}, {transform_indices = @transform_1, window_bounds = array<i64: 16, 128>}, {transform_indices = @transform_2, window_bounds = array<i64: 8, 128>}, {transform_indices = @transform_3, window_bounds = array<i64: 128, 128>}]} {
    %c0 = arith.constant 0 : index
    %c0_0 = arith.constant 0 : index
    %0 = vector.load %arg5[%c0, %c0_0] : memref<128x16xbf16, #tpu.memory_space<vmem>>, vector<128x16xbf16>
    %c0_1 = arith.constant 0 : index
    %c0_2 = arith.constant 0 : index
    %1 = vector.load %arg6[%c0_1, %c0_2] : memref<16x128xbf16, #tpu.memory_space<vmem>>, vector<16x128xbf16>
    %cst = arith.constant dense<0.000000e+00> : vector<128x128xf32>
    %2 = tpu.matmul %0, %1, %cst {dimension_numbers = #tpu.dot_dimension_numbers<[1], [0], [0], [1], [0, 0, 1, 1], [], []>} : vector<128x16xbf16>, vector<16x128xbf16>, vector<128x128xf32> -> vector<128x128xf32>
    %c2 = arith.constant 2 : index
    %c0_3 = arith.constant 0 : index
    %3 = vector.load %arg7[%c2, %c0_3] : memref<8x128xf32, #tpu.memory_space<vmem>>, vector<1x128xf32>
    %4 = vector.broadcast %3 : vector<1x128xf32> to vector<128x128xf32>
    %5 = arith.addf %2, %4 : vector<128x128xf32>
    %6 = arith.negf %5 : vector<128x128xf32>
    %7 = math.exp %6 : vector<128x128xf32>
    %cst_4 = arith.constant 1.000000e+00 : f32
    %8 = vector.broadcast %cst_4 : f32 to vector<128x128xf32>
    %9 = arith.addf %8, %7 : vector<128x128xf32>
    %10 = arith.divf %8, %9 : vector<128x128xf32>
    %11 = arith.index_cast %arg0 : i32 to index
    %12 = memref.load %arg2[%11] : memref<6xi32, #tpu.memory_space<smem>>
    %13 = arith.index_cast %arg0 : i32 to index
    %14 = memref.load %arg3[%13] : memref<6xi32, #tpu.memory_space<smem>>
    %15 = arith.sitofp %14 : i32 to f32
    %16 = arith.index_cast %arg0 : i32 to index
    %17 = memref.load %arg4[%16] : memref<6xi32, #tpu.memory_space<smem>>
    %18 = arith.sitofp %17 : i32 to f32
    %19 = tpu.iota {dimensions = array<i32: 0>} : vector<128x1xi32>
    %20 = vector.broadcast %12 : i32 to vector<128x1xi32>
    %21 = arith.addi %20, %19 : vector<128x1xi32>
    %22 = arith.sitofp %21 : vector<128x1xi32> to vector<128x1xf32>
    %cst_5 = arith.constant 5.000000e-01 : f32
    %23 = vector.broadcast %cst_5 : f32 to vector<128x1xf32>
    %24 = arith.addf %22, %23 : vector<128x1xf32>
    %25 = vector.broadcast %15 : f32 to vector<128x1xf32>
    %26 = arith.divf %24, %25 : vector<128x1xf32>
    %27 = math.floor %26 : vector<128x1xf32>
    %28 = vector.broadcast %15 : f32 to vector<128x1xf32>
    %29 = arith.mulf %27, %28 : vector<128x1xf32>
    %30 = arith.subf %22, %29 : vector<128x1xf32>
    %cst_6 = arith.constant 5.000000e-01 : f32
    %31 = vector.broadcast %cst_6 : f32 to vector<128x1xf32>
    %32 = arith.subf %30, %31 : vector<128x1xf32>
    %cst_7 = arith.constant 5.000000e-01 : f32
    %33 = vector.broadcast %cst_7 : f32 to vector<128x1xf32>
    %34 = arith.addf %27, %33 : vector<128x1xf32>
    %35 = vector.broadcast %18 : f32 to vector<128x1xf32>
    %36 = arith.divf %34, %35 : vector<128x1xf32>
    %37 = math.floor %36 : vector<128x1xf32>
    %38 = vector.broadcast %18 : f32 to vector<128x1xf32>
    %39 = arith.mulf %37, %38 : vector<128x1xf32>
    %40 = arith.subf %27, %39 : vector<128x1xf32>
    %cst_8 = arith.constant 5.000000e-01 : f32
    %41 = vector.broadcast %cst_8 : f32 to vector<128x1xf32>
    %42 = arith.subf %40, %41 : vector<128x1xf32>
    %c3 = arith.constant 3 : index
    %c0_9 = arith.constant 0 : index
    %43 = vector.load %arg7[%c3, %c0_9] : memref<8x128xf32, #tpu.memory_space<vmem>>, vector<1x128xf32>
    %44 = vector.broadcast %32 : vector<128x1xf32> to vector<128x128xf32>
    %45 = vector.broadcast %43 : vector<1x128xf32> to vector<128x128xf32>
    %46 = arith.mulf %44, %45 : vector<128x128xf32>
    %c4 = arith.constant 4 : index
    %c0_10 = arith.constant 0 : index
    %47 = vector.load %arg7[%c4, %c0_10] : memref<8x128xf32, #tpu.memory_space<vmem>>, vector<1x128xf32>
    %48 = vector.broadcast %42 : vector<128x1xf32> to vector<128x128xf32>
    %49 = vector.broadcast %47 : vector<1x128xf32> to vector<128x128xf32>
    %50 = arith.mulf %48, %49 : vector<128x128xf32>
    %51 = arith.addf %46, %50 : vector<128x128xf32>
    %c0_11 = arith.constant 0 : index
    %c0_12 = arith.constant 0 : index
    %52 = vector.load %arg7[%c0_11, %c0_12] : memref<8x128xf32, #tpu.memory_space<vmem>>, vector<1x128xf32>
    %c1 = arith.constant 1 : index
    %c0_13 = arith.constant 0 : index
    %53 = vector.load %arg7[%c1, %c0_13] : memref<8x128xf32, #tpu.memory_space<vmem>>, vector<1x128xf32>
    %54 = vector.broadcast %52 : vector<1x128xf32> to vector<128x128xf32>
    %55 = arith.mulf %54, %10 : vector<128x128xf32>
    %56 = vector.broadcast %53 : vector<1x128xf32> to vector<128x128xf32>
    %57 = arith.addf %55, %56 : vector<128x128xf32>
    %58 = arith.mulf %10, %57 : vector<128x128xf32>
    %59 = arith.addf %58, %51 : vector<128x128xf32>
    %c0_14 = arith.constant 0 : index
    %c0_15 = arith.constant 0 : index
    %60 = vector.load %arg8[%c0_14, %c0_15] : memref<128x128xf32, #tpu.memory_space<vmem>>, vector<128x128xf32>
    tpu.vector_store %arg8[%c0_14, %c0_15], %59 {strides = array<i32>} : memref<128x128xf32, #tpu.memory_space<vmem>>, vector<128x128xf32>,
    return
  }
  func.func @transform_0(%arg0: i32, %arg1: memref<6xi32, #tpu.memory_space<smem>>, %arg2: memref<6xi32, #tpu.memory_space<smem>>, %arg3: memref<6xi32, #tpu.memory_space<smem>>, %arg4: memref<6xi32, #tpu.memory_space<smem>>) -> (i32, i32) {
    %c0_i32 = arith.constant 0 : i32
    %c0_i32_0 = arith.constant 0 : i32
    return %arg0, %c0_i32 : i32, i32
  }
  func.func @transform_1(%arg0: i32, %arg1: memref<6xi32, #tpu.memory_space<smem>>, %arg2: memref<6xi32, #tpu.memory_space<smem>>, %arg3: memref<6xi32, #tpu.memory_space<smem>>, %arg4: memref<6xi32, #tpu.memory_space<smem>>) -> (i32, i32) {
    %0 = arith.index_cast %arg0 : i32 to index
    %1 = memref.load %arg1[%0] : memref<6xi32, #tpu.memory_space<smem>>
    %c0_i32 = arith.constant 0 : i32
    %c0_i32_0 = arith.constant 0 : i32
    return %1, %c0_i32 : i32, i32
  }
  func.func @transform_2(%arg0: i32, %arg1: memref<6xi32, #tpu.memory_space<smem>>, %arg2: memref<6xi32, #tpu.memory_space<smem>>, %arg3: memref<6xi32, #tpu.memory_space<smem>>, %arg4: memref<6xi32, #tpu.memory_space<smem>>) -> (i32, i32) {
    %0 = arith.index_cast %arg0 : i32 to index
    %1 = memref.load %arg1[%0] : memref<6xi32, #tpu.memory_space<smem>>
    %c0_i32 = arith.constant 0 : i32
    %c0_i32_0 = arith.constant 0 : i32
    return %1, %c0_i32 : i32, i32
  }
  func.func @transform_3(%arg0: i32, %arg1: memref<6xi32, #tpu.memory_space<smem>>, %arg2: memref<6xi32, #tpu.memory_space<smem>>, %arg3: memref<6xi32, #tpu.memory_space<smem>>, %arg4: memref<6xi32, #tpu.memory_space<smem>>) -> (i32, i32) {
    %c0_i32 = arith.constant 0 : i32
    %c0_i32_0 = arith.constant 0 : i32
    return %arg0, %c0_i32 : i32, i32
  }
}

</mosaic_0001>

<bundles_post_ra>
// kernel: yolo_detect_forward.3
= control target key start
LH: loop header
LB: loop body
LE: loop exit
PB: predicated region body
PF: predicated region fallthrough
CT: control target
= control target key end

     0   :  { %s1873_s0 = inlined_call_operand.vmem [shape: s32[6], index: 0, kind: input, shape index: {}]   ;;  %s1874_s4 = inlined_call_operand.vmem [shape: bf16[768,16], index: 4, kind: input, shape index: {}]   ;;  %s1875_s5 = inlined_call_operand.vmem [shape: bf16[48,128], index: 5, kind: input, shape index: {}]   ;;  %s1876_s6 = inlined_call_operand.vmem [shape: f32[24,128], index: 6, kind: input, shape index: {}]   ;;  %s1877_s7 = inlined_call_operand.vmem [shape: f32[768,128], index: 7, kind: output, shape index: {}]   ;;  %s1878_s1 = inlined_call_operand.vmem [shape: s32[6], index: 1, kind: input, shape index: {}]   ;;  %s1879_s2 = inlined_call_operand.vmem [shape: s32[6], index: 2, kind: input, shape index: {}, may-alias: {2,3}]   ;;  %s1880_s3 = inlined_call_operand.vmem [shape: s32[6], index: 3, kind: input, shape index: {}, may-alias: {2,3}]  }
   0x1   :  { %s12_s26 = sshll.u32 %s1873_s0, 4  ;;  %s16_s29 = sshll.u32 %s1878_s1, 4  ;;  %s13_s26 = int_to_ptr.vmem [resolvable:$true] %s12_s26  ;;  %s17_s29 = int_to_ptr.vmem [resolvable:$true] %s16_s29 }
   0x2   :  { %s1218_s30 = scalar_lea.vmem %s13_s26, 16  ;;  %p1223_p1 = scmp.lt.s32.totalorder %s13_s26, %s13_s26 }
   0x3   :  { %p1219_p0 = scmp.ne.s32.totalorder %s13_s26, %s1218_s30  ;;  %p1224_p2 = scmp.lt.s32.totalorder %s1218_s30, %s1218_s30 }
   0x5   :  { %p1225_p3 = por %p1224_p2, %p1223_p1 }
   0x7   :  { %p1226_p4 = pnand %p1225_p3, %p1219_p0 }
   0x9   :  { %1229 = shalt.err (!%p1226_p4)  }
   0xa   :  { %s1276_s8 = smov [#allocation3]   ;;  %s1230_s9 = scalar_lea.vmem %s17_s29, 16 }
   0xb   :  { %15 = dma.vmem_to_smem %s13_s26, 16, %s1276_s8, [#allocation2] }
   0xc   :  { %p1231_p5 = scmp.ne.s32.totalorder %s17_s29, %s1230_s9  ;;  %p1235_p6 = scmp.lt.s32.totalorder %s17_s29, %s17_s29 }
   0xd   :  { %p1236_p7 = scmp.lt.s32.totalorder %s1230_s9, %s1230_s9 }
   0xf   :  { %p1237_p8 = por %p1236_p7, %p1235_p6 }
  0x11   :  { %p1238_p9 = pnand %p1237_p8, %p1231_p5 }
  0x13   :  { %1241 = shalt.err (!%p1238_p9)  }
  0x14   :  { %s1277_s0 = smov [#allocation4]   ;;  %s20_s11 = sshll.u32 %s1879_s2, 4  ;;  %s21_s11 = int_to_ptr.vmem [resolvable:$true] %s20_s11 }
  0x15   :  { %19 = dma.vmem_to_smem %s17_s29, 16, %s1277_s0, [#allocation2] }
  0x16   :  { %s24_s14 = sshll.u32 %s1880_s3, 4  ;;  %s1242_s15 = scalar_lea.vmem %s21_s11, 16  ;;  %s25_s14 = int_to_ptr.vmem [resolvable:$true] %s24_s14 }
  0x17   :  { %p1243_p10 = scmp.ne.s32.totalorder %s21_s11, %s1242_s15  ;;  %p1247_p11 = scmp.lt.s32.totalorder %s21_s11, %s21_s11 }
  0x18   :  { %p1248_p12 = scmp.lt.s32.totalorder %s1242_s15, %s1242_s15 }
  0x1a   :  { %p1249_p13 = por %p1248_p12, %p1247_p11 }
  0x1c   :  { %p1250_p0 = pnand %p1249_p13, %p1243_p10 }
  0x1e   :  { %1253 = shalt.err (!%p1250_p0)  }
  0x1f   :  { %s1278_s16 = smov [#allocation5]   ;;  %s1254_s17 = scalar_lea.vmem %s25_s14, 16 }
  0x20   :  { %23 = dma.vmem_to_smem %s21_s11, 16, %s1278_s16, [#allocation2] }
  0x21   :  { %p1255_p1 = scmp.ne.s32.totalorder %s25_s14, %s1254_s17  ;;  %p1259_p2 = scmp.lt.s32.totalorder %s25_s14, %s25_s14 }
  0x22   :  { %p1260_p3 = scmp.lt.s32.totalorder %s1254_s17, %s1254_s17 }
  0x24   :  { %p1261_p4 = por %p1260_p3, %p1259_p2 }
  0x26   :  { %p1262_p5 = pnand %p1261_p4, %p1255_p1 }
  0x28   :  { %1265 = shalt.err (!%p1262_p5)  }
  0x29   :  { %s1279_s2 = smov [#allocation6]  }
  0x2a   :  { %27 = dma.vmem_to_smem %s25_s14, 16, %s1279_s2, [#allocation2] }
  0x2b   :  { %1270 = dma.done.wait [#allocation2], 64 }
  0x2c   :  { %1271 = vsyncadd [#allocation2], 4294967232 }
  0x2d   :  { %29 = sfence }
  0x2e   :  { %s1332_s3 = smov 0  }
  0x2f LB: > { %s1338_s18 = sadd.s32 4294967295, %s1274_s3   ;;  %p1020_p6 = scmp.ge.s32.totalorder %s1274_s3, 1  ;;  %s1274_s3 = sphi %s1332_s3, %s35_s3  }
  0x30   : > { %p188_p7 = scmp.lt.s32.totalorder %s1274_s3, 7 }
  0x32   : > { %p189_p8 = pnand %p1020_p6, %p188_p7 }
  0x33   : > { %s229_s19 = sld [smem:[#allocation3 + %s1338_s18]] (!%p189_p8)  ;;  %s1021_s20 = sshll.u32 (!%p189_p8), %s1338_s18, 4 }
  0x34   : > { %192 = sbr.rel (%p189_p8) target bundleno = 319 (0x13f), region = 32  ;;  %p224_p9 = scmp.lt.s32.totalorder (!%p189_p8), %s1021_s20, 95 }
  0x35   : > { %s538_s30 = sld [smem:[#allocation5 + %s1338_s18]] (!%p189_p8) }
  0x36   : > { %s537_s8 = sld [smem:[#allocation4 + %s1338_s18]] (!%p189_p8) }
  0x37   : > { %s540_s0 = sld [smem:[#allocation6 + %s1338_s18]] (!%p189_p8) }
  0x38   : > { %s1412_s10 = sld [smem:[#allocation3 + %s1338_s18]] (!%p189_p8) }
  0x39   : > { %s1882_s20 = smov (!%p224_p9, %s1021_s20), 95  ;;  %s1023_s22 = sshll.u32 %s229_s19, 1  ;;  %vm319_vm0 = vcmask 130048   ;;  %v542_v9 = vlaneseq }
  0x3a   : > { %s1022_s21 = sshll.u32 %s1882_s20, 2  ;;  %p231_p10 = scmp.lt.s32.totalorder %s1023_s22, 5 }
  0x3b   : > { %s227_s25 = scalar_lea.vmem %s1874_s4, %s1022_s21  ;;  %s539_s9 = scvt.s32.f32 %s538_s30  ;;  %v1363_v10 = vshrl.u32 %v542_v9, 7 }
  0x3c   : > { %v1142_v0 = vld [vmem:[%s227_s25] sm:$0xff]   ;;  %s1884_s22 = smov (!%p231_p10, %s1023_s22), 5  ;;  %v1144_v3 = vld [vmem:[%s227_s25 + $0x8] sm:$0xff]   ;;  %v1146_v5 = vld [vmem:[%s227_s25 + $0x10] sm:$0xff]   ;;  %v1370_v13 = vstv %s537_s8  ;;  %s1027_s15 = sshll.u32 %s1882_s20, 3 }
  0x3d   : > { %v1143_v1 = vld [vmem:[%s227_s25 + $0x20] sm:$0xff]   ;;  %1111 = vmatprep.mubr.msk.bf16.mxu0 %vm319_vm0, %v1142_v0  ;;  %s1024_s26 = sshll.u32 %s1884_s22, 2  ;;  %v1145_v4 = vld [vmem:[%s227_s25 + $0x28] sm:$0xff]   ;;  %v1147_v6 = vld [vmem:[%s227_s25 + $0x30] sm:$0xff]   ;;  %v1366_v11 = vstv %s539_s9  ;;  %v545_v12 = vadd.s32 16, %v1363_v10  ;;  %v553_v14 = vadd.s32 80, %v1363_v10  ;;  %s541_s1 = scvt.s32.f32 %s540_s0  ;;  %v1387_v22 = vadd.s32 %v1370_v13, %v1363_v10 }
  0x3e   : > { %1119 = vmatprep.mubr.msk.bf16.mxu1 %vm319_vm0, %v1143_v1  ;;  %s234_s29 = scalar_lea.vmem %s1875_s5, %s1024_s26  ;;  %v1148_v7 = vld [vmem:[%s227_s25 + $0x18] sm:$0xff]   ;;  %1150 = vrcp.f32 %v1366_v11  ;;  %v551_v19 = vadd.s32 64, %v1363_v10  ;;  %v546_v26 = vadd.s32 24, %v1363_v10  ;;  %v554_v35 = vadd.s32 88, %v1363_v10  ;;  %p238_p11 = scmp.lt.s32.totalorder %s1412_s10, 2 }
  0x3f   : > { %v1141_v2 = vld [vmem:[%s234_s29] sm:$0xff]   ;;  %v1149_v8 = vld [vmem:[%s227_s25 + $0x38] sm:$0xff]   ;;  %v1374_v15 = vadd.s32 %v1370_v13, %v545_v12  ;;  %v1377_v16 = vadd.s32 %v1370_v13, %v553_v14  ;;  %v1380_v18 = vstv %s541_s1  ;;  %v576_v28 = vcvt.s32.f32 %v1387_v22  ;;  %s1807_s2 = scalar_lea.vmem %s1877_s7, %s1027_s15 }
  0x40   : > { %1109 = vmatprep.subr.bf16.mxu0 %v1141_v2  ;;  %1127 = vmatprep.subr.bf16.mxu1 %v1141_v2  ;;  %1152 = vrcp.f32 %v1380_v18  ;;  %v1392_v24 = vadd.s32 %v1370_v13, %v551_v19  ;;  %v1402_v31 = vadd.s32 %v1370_v13, %v546_v26  ;;  %v544_v38 = vadd.s32 8, %v1363_v10  ;;  %s1886_s10 = smov (!%p238_p11, %s1412_s10), 2 }
  0x41   : > { %1110 = vmatpush3.bf16.msra.mxu0 %v1141_v2  ;;  %1128 = vmatpush3.bf16.msra.mxu1 %v1141_v2  ;;  %v578_v17 = vcvt.s32.f32 %v1374_v15  ;;  %v586_v20 = vcvt.s32.f32 %v1377_v16  ;;  %v592_v33 = vadd.f32 0.5, %v576_v28  ;;  %v552_v43 = vadd.s32 72, %v1363_v10  ;;  %s1025_s11 = sshll.u32 %s1886_s10, 3 }
  0x42   : > { %v584_v29 = vcvt.s32.f32 %v1392_v24  ;;  %v579_v37 = vcvt.s32.f32 %v1402_v31  ;;  %v1425_v44 = vadd.s32 %v1370_v13, %v554_v35  ;;  %v1431_v47 = vadd.s32 %v1370_v13, %v544_v38  ;;  %s1484_s14 = scalar_lea.vmem %s1876_s6, %s1025_s11 }
  0x43   : > { %v594_v21 = vadd.f32 0.5, %v578_v17  ;;  %v602_v25 = vadd.f32 0.5, %v586_v20  ;;  %v1439_v51 = vadd.s32 %v1370_v13, %v552_v43  ;;  %v549_v56 = vadd.s32 48, %v1363_v10 }
  0x44   : > { %1112 = vmatmul.mubr.msk.bf16.vlgmr.msra.gmra.mxu0 %vm319_vm0, %v1144_v3  ;;  %1120 = vmatmul.mubr.msk.bf16.vlgmr.msra.gmra.mxu1 %vm319_vm0, %v1145_v4  ;;  %v600_v34 = vadd.f32 0.5, %v584_v29  ;;  %v595_v46 = vadd.f32 0.5, %v579_v37  ;;  %v587_v52 = vcvt.s32.f32 %v1425_v44  ;;  %v577_v55 = vcvt.s32.f32 %v1431_v47 }
  0x45   : > { %1115 = vmatprep.mubr.msk.bf16.mxu0 %vm319_vm0, %v1146_v5  ;;  %1123 = vmatprep.mubr.msk.bf16.mxu1 %vm319_vm0, %v1147_v6  ;;  %v557_v59 = vadd.s32 112, %v1363_v10  ;;  %v585_v61 = vcvt.s32.f32 %v1439_v51  ;;  %v1461_v3 = vadd.s32 %v1370_v13, %v549_v56 }
  0x46   : > { %v603_v63 = vadd.f32 0.5, %v587_v52  ;;  %v593_v2 = vadd.f32 0.5, %v577_v55 }
  0x47   : > { %v1466_v6 = vadd.s32 %v1370_v13, %v557_v59 }
  0x4b   : > { %v1389_v23 = vpop.eup %1150 }
  0x4c   : > { %1116 = vmatmul.mubr.msk.bf16.gmra.mxu0 %vm319_vm0, %v1148_v7  ;;  %1124 = vmatmul.mubr.msk.bf16.gmra.mxu1 %vm319_vm0, %v1149_v8  ;;  %v612_v27 = vmul.f32 %v1389_v23, %v594_v21  ;;  %v620_v30 = vmul.f32 %v1389_v23, %v602_v25  ;;  %v610_v40 = vmul.f32 %v1389_v23, %v592_v33  ;;  %v601_v8 = vadd.f32 0.5, %v585_v61 }
  0x4d   : > { %v1420_v41 = vpop.eup %1152  ;;  %v618_v42 = vmul.f32 %v1389_v23, %v600_v34  ;;  %v613_v54 = vmul.f32 %v1389_v23, %v595_v46  ;;  %v621_v14 = vmul.f32 %v1389_v23, %v603_v63  ;;  %v611_v21 = vmul.f32 %v1389_v23, %v593_v2 }
  0x4e   : > { %v1404_v32 = vfloor.f32 %v612_v27  ;;  %v1414_v36 = vfloor.f32 %v620_v30  ;;  %v1434_v49 = vfloor.f32 %v610_v40  ;;  %v582_v25 = vcvt.s32.f32 %v1461_v3 }
  0x4f   : > { %v1436_v50 = vfloor.f32 %v618_v42  ;;  %v1456_v1 = vfloor.f32 %v613_v54  ;;  %v590_v30 = vcvt.s32.f32 %v1466_v6  ;;  %v619_v33 = vmul.f32 %v1389_v23, %v601_v8 }
  0x50   : > { %v692_v39 = vadd.f32 0.5, %v1404_v32  ;;  %v700_v45 = vadd.f32 0.5, %v1414_v36  ;;  %v690_v58 = vadd.f32 0.5, %v1434_v49  ;;  %v644_v62 = vmul.f32 %v1404_v32, %v1366_v11 }
  0x51   : > { %v698_v60 = vadd.f32 0.5, %v1436_v50  ;;  %v652_v12 = vmul.f32 %v1414_v36, %v1366_v11  ;;  %v693_v19 = vadd.f32 0.5, %v1456_v1  ;;  %v1488_v38 = vfloor.f32 %v621_v14 }
  0x52   : > { %v710_v48 = vmul.f32 %v1420_v41, %v692_v39  ;;  %v718_v53 = vmul.f32 %v1420_v41, %v700_v45  ;;  %v708_v5 = vmul.f32 %v1420_v41, %v690_v58  ;;  %v660_v9 = vsub.f32 %v578_v17, %v644_v62  ;;  %v1492_v39 = vld [vmem:[%s1484_s14 + $0x3] ss:$0 sm:$0xff] }
  0x53   : > { %v716_v7 = vmul.f32 %v1420_v41, %v698_v60  ;;  %v668_v35 = vsub.f32 %v586_v20, %v652_v12  ;;  %v711_v42 = vmul.f32 %v1420_v41, %v693_v19  ;;  %v1496_v43 = vfloor.f32 %v611_v21 }
  0x54   : > { %v726_v57 = vfloor.f32 %v710_v48  ;;  %v734_v0 = vfloor.f32 %v718_v53  ;;  %v724_v27 = vfloor.f32 %v708_v5  ;;  %v1064_v34 = vadd.f32 -0.5, %v660_v9  ;;  %v1506_v53 = vld [vmem:[%s1484_s14 + $0x4] ss:$0 sm:$0xff] }
  0x55   : > { %v732_v17 = vfloor.f32 %v716_v7  ;;  %v598_v45 = vadd.f32 0.5, %v582_v25  ;;  %v642_v16 = vmul.f32 %v1434_v49, %v1366_v11  ;;  %v606_v48 = vadd.f32 0.5, %v590_v30 }
  0x56   : > { %v742_v4 = vmul.f32 %v726_v57, %v1380_v18  ;;  %v750_v15 = vmul.f32 %v734_v0, %v1380_v18  ;;  %v740_v20 = vmul.f32 %v724_v27, %v1380_v18  ;;  %v1511_v56 = vfloor.f32 %v619_v33 }
  0x57   : > { %v748_v54 = vmul.f32 %v732_v17, %v1380_v18  ;;  %v555_v57 = vadd.s32 96, %v1363_v10  ;;  %v795_v58 = vmul.f32 %v1492_v39, %v1064_v34  ;;  %v1072_v59 = vadd.f32 -0.5, %v668_v35 }
  0x58   : > { %v758_v26 = vsub.f32 %v1404_v32, %v742_v4  ;;  %v547_v32 = vadd.s32 32, %v1363_v10  ;;  %v766_v40 = vsub.f32 %v1414_v36, %v750_v15  ;;  %v650_v36 = vmul.f32 %v1436_v50, %v1366_v11 }
  0x59   : > { %v701_v60 = vadd.f32 0.5, %v1488_v38  ;;  %v727_v0 = vfloor.f32 %v711_v42  ;;  %v691_v2 = vadd.f32 0.5, %v1496_v43  ;;  %v616_v4 = vmul.f32 %v1389_v23, %v598_v45 }
  0x5a   : > { %v1080_v46 = vadd.f32 -0.5, %v758_v26  ;;  %v1517_v62 = vadd.s32 %v1370_v13, %v547_v32  ;;  %v1088_v63 = vadd.f32 -0.5, %v766_v40  ;;  %v658_v7 = vsub.f32 %v576_v28, %v642_v16 }
  0x5b   : > { %v756_v8 = vsub.f32 %v1434_v49, %v740_v20  ;;  %v624_v9 = vmul.f32 %v1389_v23, %v606_v48  ;;  %v666_v12 = vsub.f32 %v584_v29, %v650_v36  ;;  %v764_v14 = vsub.f32 %v1436_v50, %v748_v54 }
  0x5c   : > { %v816_v5 = vmul.f32 %v1506_v53, %v1080_v46  ;;  %v699_v15 = vadd.f32 0.5, %v1511_v56  ;;  %v1531_v19 = vadd.s32 %v1370_v13, %v555_v57  ;;  %v803_v21 = vmul.f32 %v1492_v39, %v1072_v59 }
  0x5d   : > { %v645_v22 = vmul.f32 %v1456_v1, %v1366_v11  ;;  %v719_v28 = vmul.f32 %v1420_v41, %v701_v60  ;;  %v580_v49 = vcvt.s32.f32 %v1517_v62  ;;  %v824_v26 = vmul.f32 %v1506_v53, %v1088_v63 }
  0x5e   : > { %v743_v24 = vmul.f32 %v727_v0, %v1380_v18  ;;  %v709_v29 = vmul.f32 %v1420_v41, %v691_v2  ;;  %v1541_v50 = vfloor.f32 %v616_v4  ;;  %v1543_v27 = vadd.f32 %v816_v5, %v795_v58 }
  0x5f   : > { %v1062_v17 = vadd.f32 -0.5, %v658_v7  ;;  %v1078_v33 = vadd.f32 -0.5, %v756_v8  ;;  %v1545_v34 = vfloor.f32 %v624_v9  ;;  %v1070_v35 = vadd.f32 -0.5, %v666_v12 }
  0x60   : > { %v1086_v32 = vadd.f32 -0.5, %v764_v14  ;;  %v717_v40 = vmul.f32 %v1420_v41, %v699_v15  ;;  %v588_v42 = vcvt.s32.f32 %v1531_v19  ;;  %v661_v45 = vsub.f32 %v579_v37, %v645_v22 }
  0x61   : > { %v653_v46 = vmul.f32 %v1488_v38, %v1366_v11  ;;  %v735_v16 = vfloor.f32 %v719_v28  ;;  %v596_v20 = vadd.f32 0.5, %v580_v49  ;;  %v759_v48 = vsub.f32 %v1456_v1, %v743_v24 }
  0x62   : > { %v643_v36 = vmul.f32 %v1496_v43, %v1366_v11  ;;  %v725_v54 = vfloor.f32 %v709_v29  ;;  %v696_v57 = vadd.f32 0.5, %v1541_v50  ;;  %v793_v58 = vmul.f32 %v1492_v39, %v1062_v17 }
  0x63   : > { %v814_v31 = vmul.f32 %v1506_v53, %v1078_v33  ;;  %v704_v37 = vadd.f32 0.5, %v1545_v34  ;;  %v550_v59 = vadd.s32 56, %v1363_v10  ;;  %v801_v60 = vmul.f32 %v1492_v39, %v1070_v35 }
  0x64   : > { %v822_v63 = vmul.f32 %v1506_v53, %v1086_v32  ;;  %v733_v0 = vfloor.f32 %v717_v40  ;;  %v604_v1 = vadd.f32 0.5, %v588_v42  ;;  %v1065_v2 = vadd.f32 -0.5, %v661_v45 }
  0x65   : > { %v669_v4 = vsub.f32 %v587_v52, %v653_v46  ;;  %v751_v5 = vmul.f32 %v735_v16, %v1380_v18  ;;  %v614_v7 = vmul.f32 %v1389_v23, %v596_v20  ;;  %v1081_v8 = vadd.f32 -0.5, %v759_v48 }
  0x66   : > { %v659_v9 = vsub.f32 %v577_v55, %v643_v36  ;;  %v741_v12 = vmul.f32 %v725_v54, %v1380_v18  ;;  %v714_v14 = vmul.f32 %v1420_v41, %v696_v57  ;;  %v1575_v15 = vadd.f32 %v824_v26, %v803_v21 }
  0x67   : > { %v651_v22 = vmul.f32 %v1511_v56, %v1366_v11  ;;  %v722_v44 = vmul.f32 %v1420_v41, %v704_v37  ;;  %v1581_v52 = vadd.s32 %v1370_v13, %v550_v59  ;;  %v1583_v28 = vadd.f32 %v814_v31, %v793_v58 }
  0x68   : > { %v1585_v24 = vadd.f32 %v822_v63, %v801_v60  ;;  %v749_v47 = vmul.f32 %v733_v0, %v1380_v18  ;;  %v622_v55 = vmul.f32 %v1389_v23, %v604_v1  ;;  %v796_v29 = vmul.f32 %v1492_v39, %v1065_v2 }
  0x69   : > { %v1073_v21 = vadd.f32 -0.5, %v669_v4  ;;  %v767_v26 = vsub.f32 %v1488_v38, %v751_v5  ;;  %v1591_v17 = vfloor.f32 %v614_v7  ;;  %v817_v33 = vmul.f32 %v1506_v53, %v1081_v8 }
  0x6a   : > { %v1063_v35 = vadd.f32 -0.5, %v659_v9  ;;  %v757_v32 = vsub.f32 %v1496_v43, %v741_v12  ;;  %v730_v40 = vfloor.f32 %v714_v14  ;;  %v667_v45 = vsub.f32 %v585_v61, %v651_v22 }
  0x6b   : > { %v738_v46 = vfloor.f32 %v722_v44  ;;  %v583_v16 = vcvt.s32.f32 %v1581_v52  ;;  %v558_v20 = vadd.s32 120, %v1363_v10  ;;  %v765_v48 = vsub.f32 %v1511_v56, %v749_v47 }
  0x6c   : > { %v648_v38 = vmul.f32 %v1541_v50, %v1366_v11  ;;  %v656_v36 = vmul.f32 %v1545_v34, %v1366_v11  ;;  %v1604_v54 = vfloor.f32 %v622_v55  ;;  %v1089_v43 = vadd.f32 -0.5, %v767_v26 }
  0x6d   : > { %v804_v57 = vmul.f32 %v1492_v39, %v1073_v21  ;;  %v646_v51 = vmul.f32 %v1591_v17, %v1366_v11  ;;  %v694_v61 = vadd.f32 0.5, %v1591_v17  ;;  %v1079_v58 = vadd.f32 -0.5, %v757_v32 }
  0x6e   : > { %v794_v31 = vmul.f32 %v1492_v39, %v1063_v35  ;;  %v746_v56 = vmul.f32 %v730_v40, %v1380_v18  ;;  %v654_v37 = vmul.f32 %v1604_v54, %v1366_v11  ;;  %v1071_v59 = vadd.f32 -0.5, %v667_v45  ;;  %v1652_v40 = vld [vmem:[%s1484_s14 + $0x2] ss:$0 sm:$0xff] }
  0x6f   : > { %v754_v60 = vmul.f32 %v738_v46, %v1380_v18  ;;  %v1616_v63 = vadd.s32 %v1370_v13, %v558_v20  ;;  %v548_v0 = vadd.s32 40, %v1363_v10  ;;  %v1087_v1 = vadd.f32 -0.5, %v765_v48 }
  0x70   : > { %v664_v2 = vsub.f32 %v582_v25, %v648_v38  ;;  %v672_v4 = vsub.f32 %v590_v30, %v656_v36  ;;  %v599_v5 = vadd.f32 0.5, %v583_v16  ;;  %v662_v7 = vsub.f32 %v580_v49, %v646_v51 }
  0x71   : > { %v712_v8 = vmul.f32 %v1420_v41, %v694_v61  ;;  %v702_v9 = vadd.f32 0.5, %v1604_v54  ;;  %v556_v12 = vadd.s32 104, %v1363_v10  ;;  %v825_v14 = vmul.f32 %v1506_v53, %v1089_v43 }
  0x72   : > { %v815_v3 = vmul.f32 %v1506_v53, %v1079_v58  ;;  %v762_v25 = vsub.f32 %v1541_v50, %v746_v56  ;;  %v670_v6 = vsub.f32 %v588_v42, %v654_v37  ;;  %v802_v30 = vmul.f32 %v1492_v39, %v1071_v59 }
  0x73   : > { %v770_v62 = vsub.f32 %v1545_v34, %v754_v60  ;;  %v591_v49 = vcvt.s32.f32 %v1616_v63  ;;  %v1639_v22 = vadd.s32 %v1370_v13, %v548_v0  ;;  %v823_v10 = vmul.f32 %v1506_v53, %v1087_v1 }
  0x74   : > { %v1068_v44 = vadd.f32 -0.5, %v664_v2  ;;  %v1076_v47 = vadd.f32 -0.5, %v672_v4  ;;  %v617_v55 = vmul.f32 %v1389_v23, %v599_v5  ;;  %v1066_v50 = vadd.f32 -0.5, %v662_v7 }
  0x75   : > { %v728_v21 = vfloor.f32 %v712_v8  ;;  %v720_v19 = vmul.f32 %v1420_v41, %v702_v9  ;;  %v1645_v42 = vadd.s32 %v1370_v13, %v556_v12  ;;  %v1647_v26 = vadd.f32 %v817_v33, %v796_v29 }
  0x76   : > { %v1649_v34 = vadd.f32 %v825_v14, %v804_v57  ;;  %v1084_v35 = vadd.f32 -0.5, %v762_v25  ;;  %v1074_v32 = vadd.f32 -0.5, %v670_v6  ;;  %v1654_v45 = vadd.f32 %v815_v3, %v794_v31 }
  0x77   : > { %v1092_v46 = vadd.f32 -0.5, %v770_v62  ;;  %v607_v20 = vadd.f32 0.5, %v591_v49  ;;  %v581_v48 = vcvt.s32.f32 %v1639_v22  ;;  %v1659_v38 = vadd.f32 %v823_v10, %v802_v30 }
  0x78   : > { %v1662_v13 = vmul.f32 %v1492_v39, %v1068_v44  ;;  %v1665_v29 = vmul.f32 %v1492_v39, %v1076_v47  ;;  %v1667_v33 = vfloor.f32 %v617_v55  ;;  %v1670_v57 = vmul.f32 %v728_v21, %v1380_v18 }
  0x79   : > { %v1673_v51 = vmul.f32 %v1492_v39, %v1066_v50  ;;  %v736_v61 = vfloor.f32 %v720_v19  ;;  %v589_v58 = vcvt.s32.f32 %v1645_v42  ;;  %v1679_v37 = vmul.f32 %v1506_v53, %v1084_v35 }
  0x7a   : > { %v1682_v59 = vmul.f32 %v1492_v39, %v1074_v32  ;;  %v1685_v1 = vmul.f32 %v1506_v53, %v1092_v46  ;;  %v649_v2 = vmul.f32 %v1667_v33, %v1366_v11  ;;  %v625_v4 = vmul.f32 %v1389_v23, %v607_v20 }
  0x7b   : > { %v597_v5 = vadd.f32 0.5, %v581_v48  ;;  %v760_v25 = vsub.f32 %v1591_v17, %v1670_v57  ;;  %v1697_v6 = vmul.f32 %v736_v61, %v1380_v18  ;;  %v697_v30 = vadd.f32 0.5, %v1667_v33 }
  0x7c   : > { %v605_v62 = vadd.f32 0.5, %v589_v58  ;;  %v1704_v19 = vfloor.f32 %v625_v4  ;;  %v665_v57 = vsub.f32 %v583_v16, %v649_v2 }
  0x7d   : > { %v615_v17 = vmul.f32 %v1389_v23, %v597_v5 }
  0x7e   : > { %v623_v61 = vmul.f32 %v1389_v23, %v605_v62 }
 0x104   : > { %v1113_v36 = vpop.f32.mrf.mxu0  ;;  %v1121_v43 = vpop.f32.mrf.mxu1 }
 0x105   : > { %v387_v31 = vadd.f32 %v1113_v36, %v1652_v40  ;;  %v419_v56 = vadd.f32 %v1121_v43, %v1652_v40 }
 0x106   : > { %v378_v60 = vpop.f32.mrf.mxu0  ;;  %v410_v0 = vpop.f32.mrf.mxu1 }
 0x107   : > { %v1048_v7 = vmul.f32 -1.442695, %v387_v31  ;;  %v1056_v8 = vmul.f32 -1.442695, %v419_v56  ;;  %v379_v9 = vadd.f32 %v1652_v40, %v378_v60  ;;  %v411_v12 = vadd.f32 %v1652_v40, %v410_v0 }
 0x108   : > { %v1114_v14 = vpop.f32.mrf.mxu0  ;;  %v1122_v3 = vpop.f32.mrf.mxu1 }
 0x109   : > { %1154 = vpow2.f32 %v1048_v7  ;;  %v1046_v10 = vmul.f32 -1.442695, %v379_v9  ;;  %v1054_v44 = vmul.f32 -1.442695, %v411_v12  ;;  %v390_v47 = vadd.f32 %v1114_v14, %v1652_v40 }
 0x10a   : > { %1156 = vpow2.f32 %v1056_v8  ;;  %v422_v55 = vadd.f32 %v1122_v3, %v1652_v40  ;;  %v381_v50 = vpop.f32.mrf.mxu0  ;;  %v413_v21 = vpop.f32.mrf.mxu1  ;;  %v705_v7 = vadd.f32 0.5, %v1704_v19  ;;  %v1715_v8 = vfloor.f32 %v615_v17 }
 0x10b   : > { %1158 = vpow2.f32 %v1046_v10  ;;  %v1049_v35 = vmul.f32 -1.442695, %v390_v47  ;;  %v382_v32 = vadd.f32 %v1652_v40, %v381_v50  ;;  %v414_v46 = vadd.f32 %v1652_v40, %v413_v21 }
 0x10c   : > { %1160 = vpow2.f32 %v1054_v44  ;;  %v1057_v20 = vmul.f32 -1.442695, %v422_v55  ;;  %v1117_v36 = vpop.f32.mrf.mxu0  ;;  %v1125_v43 = vpop.f32.mrf.mxu1  ;;  %v715_v12 = vmul.f32 %v1420_v41, %v697_v30  ;;  %v1720_v3 = vfloor.f32 %v623_v61 }
 0x10d   : > { %1162 = vpow2.f32 %v1049_v35  ;;  %v1047_v31 = vmul.f32 -1.442695, %v382_v32  ;;  %v1055_v56 = vmul.f32 -1.442695, %v414_v46  ;;  %v403_v60 = vadd.f32 %v1117_v36, %v1652_v40 }
 0x10e   : > { %1164 = vpow2.f32 %v1057_v20  ;;  %v435_v0 = vadd.f32 %v1125_v43, %v1652_v40  ;;  %v394_v4 = vpop.f32.mrf.mxu0  ;;  %v426_v5 = vpop.f32.mrf.mxu1  ;;  %v723_v55 = vmul.f32 %v1420_v41, %v705_v7  ;;  %v695_v21 = vadd.f32 0.5, %v1715_v8 }
 0x10f   : > { %1166 = vpow2.f32 %v1047_v31  ;;  %v1052_v9 = vmul.f32 -1.442695, %v403_v60  ;;  %v395_v52 = vadd.f32 %v1652_v40, %v394_v4  ;;  %v427_v23 = vadd.f32 %v1652_v40, %v426_v5 }
 0x110   : > { %1168 = vpow2.f32 %v1055_v56  ;;  %v1060_v16 = vmul.f32 -1.442695, %v435_v0  ;;  %v1118_v2 = vpop.f32.mrf.mxu0  ;;  %v1126_v14 = vpop.f32.mrf.mxu1  ;;  %v1082_v46 = vadd.f32 -0.5, %v760_v25  ;;  %v703_v36 = vadd.f32 0.5, %v1720_v3 }
 0x111   : > { %1170 = vpow2.f32 %v1052_v9  ;;  %v1050_v62 = vmul.f32 -1.442695, %v395_v52  ;;  %v1058_v10 = vmul.f32 -1.442695, %v427_v23  ;;  %v406_v44 = vadd.f32 %v1118_v2, %v1652_v40 }
 0x112   : > { %1172 = vpow2.f32 %v1060_v16  ;;  %v438_v47 = vadd.f32 %v1126_v14, %v1652_v40  ;;  %v397_v50 = vpop.f32.mrf.mxu0  ;;  %v429_v17 = vpop.f32.mrf.mxu1  ;;  %v731_v43 = vfloor.f32 %v715_v12  ;;  %v1731_v60 = vadd.f32 %v1679_v37, %v1662_v13 }
 0x113   : > { %1174 = vpow2.f32 %v1050_v62  ;;  %v1053_v35 = vmul.f32 -1.442695, %v406_v44  ;;  %v398_v30 = vadd.f32 %v1652_v40, %v397_v50  ;;  %v430_v32 = vadd.f32 %v1652_v40, %v429_v17 }
 0x114   : > { %1176 = vpow2.f32 %v1058_v10  ;;  %v1061_v20 = vmul.f32 -1.442695, %v438_v47  ;;  %v768_v0 = vsub.f32 %v1604_v54, %v1697_v6  ;;  %v713_v40 = vmul.f32 %v1420_v41, %v695_v21 }
 0x115   : > { %1178 = vpow2.f32 %v1053_v35  ;;  %v1051_v61 = vmul.f32 -1.442695, %v398_v30  ;;  %v1059_v31 = vmul.f32 -1.442695, %v430_v32  ;;  %v1738_v5 = vadd.f32 %v1685_v1, %v1665_v29 }
 0x116   : > { %v1155_v56 = vpop.eup %1154  ;;  %1180 = vpow2.f32 %v1061_v20  ;;  %v739_v7 = vfloor.f32 %v723_v55  ;;  %v1069_v23 = vadd.f32 -0.5, %v665_v57  ;;  %v721_v13 = vmul.f32 %v1420_v41, %v703_v36 }
 0x117   : > { %v1157_v25 = vpop.eup %1156  ;;  %v491_v4 = vadd.f32 1.0, %v1155_v56  ;;  %1182 = vpow2.f32 %v1051_v61  ;;  %v818_v6 = vmul.f32 %v1506_v53, %v1082_v46  ;;  %v747_v16 = vmul.f32 %v731_v43, %v1380_v18 }
 0x118   : > { %v1159_v9 = vpop.eup %1158  ;;  %v499_v52 = vadd.f32 1.0, %v1157_v25  ;;  %1184 = vpow2.f32 %v1059_v31  ;;  %v1090_v29 = vadd.f32 -0.5, %v768_v0  ;;  %v729_v1 = vfloor.f32 %v713_v40 }
 0x119   : > { %v1161_v37 = vpop.eup %1160  ;;  %1186 = vrcp.f32 %v491_v4  ;;  %v489_v54 = vadd.f32 1.0, %v1159_v9  ;;  %v657_v57 = vmul.f32 %v1704_v19, %v1366_v11  ;;  %v755_v41 = vmul.f32 %v739_v7, %v1380_v18 }
 0x11a   : > { %v1163_v2 = vpop.eup %1162  ;;  %1188 = vrcp.f32 %v499_v52  ;;  %v497_v12 = vadd.f32 1.0, %v1161_v37  ;;  %v1747_v47 = vmul.f32 %v1492_v39, %v1069_v23  ;;  %v737_v55 = vfloor.f32 %v721_v13  ;;  %v1768_v37 = vld [vmem:[%s1484_s14] ss:$0 sm:$0xff] }
 0x11b   : > { %v1165_v14 = vpop.eup %1164  ;;  %1190 = vrcp.f32 %v489_v54  ;;  %v492_v62 = vadd.f32 1.0, %v1163_v2  ;;  %v763_v17 = vsub.f32 %v1667_v33, %v747_v16  ;;  %v647_v35 = vmul.f32 %v1715_v8, %v1366_v11  ;;  %v1774_v2 = vld [vmem:[%s1484_s14 + $0x1] ss:$0 sm:$0xff] }
 0x11c   : > { %v1167_v10 = vpop.eup %1166  ;;  %1192 = vrcp.f32 %v497_v12  ;;  %v500_v44 = vadd.f32 1.0, %v1165_v14  ;;  %v745_v46 = vmul.f32 %v729_v1, %v1380_v18  ;;  %v655_v20 = vmul.f32 %v1720_v3, %v1366_v11 }
 0x11d   : > { %v1169_v50 = vpop.eup %1168  ;;  %1194 = vrcp.f32 %v492_v62  ;;  %v490_v21 = vadd.f32 1.0, %v1167_v10  ;;  %v673_v61 = vsub.f32 %v591_v49, %v657_v57  ;;  %v771_v31 = vsub.f32 %v1704_v19, %v755_v41 }
 0x11e   : > { %v1171_v30 = vpop.eup %1170  ;;  %1196 = vrcp.f32 %v500_v44  ;;  %v498_v32 = vadd.f32 1.0, %v1169_v50  ;;  %v1759_v0 = vadd.f32 %v818_v6, %v1673_v51  ;;  %v753_v40 = vmul.f32 %v737_v55, %v1380_v18 }
 0x11f   : > { %v1173_v36 = vpop.eup %1172  ;;  %1198 = vrcp.f32 %v490_v21  ;;  %v495_v43 = vadd.f32 1.0, %v1171_v30  ;;  %v1085_v4 = vadd.f32 -0.5, %v763_v17  ;;  %v663_v7 = vsub.f32 %v581_v48, %v647_v35 }
 0x120   : > { %v1175_v33 = vpop.eup %1174  ;;  %1200 = vrcp.f32 %v498_v32  ;;  %v503_v56 = vadd.f32 1.0, %v1173_v36  ;;  %v761_v19 = vsub.f32 %v1715_v8, %v745_v46  ;;  %v671_v9 = vsub.f32 %v589_v58, %v655_v20 }
 0x121   : > { %v1177_v25 = vpop.eup %1176  ;;  %1202 = vrcp.f32 %v495_v43  ;;  %v493_v11 = vadd.f32 1.0, %v1175_v33  ;;  %v1077_v52 = vadd.f32 -0.5, %v673_v61  ;;  %v1093_v23 = vadd.f32 -0.5, %v771_v31 }
 0x122   : > { %v1179_v63 = vpop.eup %1178  ;;  %1204 = vrcp.f32 %v503_v56  ;;  %v501_v49 = vadd.f32 1.0, %v1177_v25  ;;  %v826_v22 = vmul.f32 %v1506_v53, %v1090_v29  ;;  %v769_v54 = vsub.f32 %v1720_v3, %v753_v40 }
 0x123   : > { %v1181_v51 = vpop.eup %1180  ;;  %1206 = vrcp.f32 %v493_v11  ;;  %v496_v18 = vadd.f32 1.0, %v1179_v63  ;;  %v821_v42 = vmul.f32 %v1506_v53, %v1085_v4  ;;  %v1067_v8 = vadd.f32 -0.5, %v663_v7 }
 0x124   : > { %v1183_v13 = vpop.eup %1182  ;;  %1208 = vrcp.f32 %v501_v49  ;;  %v504_v48 = vadd.f32 1.0, %v1181_v51  ;;  %v1083_v12 = vadd.f32 -0.5, %v761_v19  ;;  %v1075_v14 = vadd.f32 -0.5, %v671_v9 }
 0x125   : > { %v1185_v6 = vpop.eup %1184  ;;  %1210 = vrcp.f32 %v496_v18  ;;  %v494_v58 = vadd.f32 1.0, %v1183_v13  ;;  %v808_v57 = vmul.f32 %v1492_v39, %v1077_v52  ;;  %v829_v3 = vmul.f32 %v1506_v53, %v1093_v23 }
 0x126   : > { %v1187_v16 = vpop.eup %1186  ;;  %1212 = vrcp.f32 %v504_v48  ;;  %v502_v1 = vadd.f32 1.0, %v1185_v6  ;;  %v1781_v44 = vadd.f32 %v826_v22, %v1682_v59  ;;  %v1091_v55 = vadd.f32 -0.5, %v769_v54 }
 0x127   : > { %v1189_v62 = vpop.eup %1188  ;;  %v854_v29 = vmul.f32 %v1187_v16, %v1768_v37  ;;  %1214 = vrcp.f32 %v494_v58  ;;  %v1787_v35 = vadd.f32 %v821_v42, %v1747_v47  ;;  %v1790_v30 = vmul.f32 %v1492_v39, %v1067_v8 }
 0x128   : > { %v1191_v41 = vpop.eup %1190  ;;  %v862_v10 = vmul.f32 %v1189_v62, %v1768_v37  ;;  %1216 = vrcp.f32 %v502_v1  ;;  %v1795_v20 = vmul.f32 %v1506_v53, %v1083_v12  ;;  %v1798_v36 = vmul.f32 %v1492_v39, %v1075_v14 }
 0x129   : > { %v1193_v50 = vpop.eup %1192  ;;  %v874_v21 = vadd.f32 %v1774_v2, %v854_v29  ;;  %v852_v17 = vmul.f32 %v1191_v41, %v1768_v37  ;;  %v1802_v33 = vadd.f32 %v829_v3, %v808_v57  ;;  %v1812_v11 = vmul.f32 %v1506_v53, %v1091_v55 }
 0x12a   : > { %v1195_v32 = vpop.eup %1194  ;;  %v882_v46 = vadd.f32 %v1774_v2, %v862_v10  ;;  %v860_v59 = vmul.f32 %v1193_v50, %v1768_v37 }
 0x12b   : > { %v1197_v43 = vpop.eup %1196  ;;  %v890_v61 = vmul.f32 %v1187_v16, %v874_v21  ;;  %v872_v31 = vadd.f32 %v1774_v2, %v852_v17  ;;  %v855_v47 = vmul.f32 %v1195_v32, %v1768_v37 }
 0x12c   : > { %v1199_v56 = vpop.eup %1198  ;;  %v898_v40 = vmul.f32 %v1189_v62, %v882_v46  ;;  %v880_v25 = vadd.f32 %v1774_v2, %v860_v59  ;;  %v863_v39 = vmul.f32 %v1197_v43, %v1768_v37 }
 0x12d   : > { %v1201_v4 = vpop.eup %1200  ;;  %v906_v7 = vadd.f32 %v890_v61, %v1543_v27  ;;  %v888_v63 = vmul.f32 %v1191_v41, %v872_v31  ;;  %v875_v49 = vadd.f32 %v1774_v2, %v855_v47  ;;  %v853_v19 = vmul.f32 %v1199_v56, %v1768_v37 }
 0x12e   : > { %v1203_v9 = vpop.eup %1202  ;;  %v914_v51 = vadd.f32 %v898_v40, %v1575_v15  ;;  %v896_v18 = vmul.f32 %v1193_v50, %v880_v25  ;;  %v883_v52 = vadd.f32 %v1774_v2, %v863_v39  ;;  %v861_v23 = vmul.f32 %v1201_v4, %v1768_v37 }
 0x12f   : > { %v1205_v53 = vpop.eup %1204  ;;  %922 = vst [vmem:[%s1807_s2 + $0x10] sm:$0xff] %v906_v7  ;;  %v904_v13 = vadd.f32 %v888_v63, %v1583_v28  ;;  %v891_v27 = vmul.f32 %v1195_v32, %v875_v49  ;;  %v873_v22 = vadd.f32 %v1774_v2, %v853_v19  ;;  %v858_v48 = vmul.f32 %v1203_v9, %v1768_v37 }
 0x130   : > { %v1207_v54 = vpop.eup %1206  ;;  %930 = vst [vmem:[%s1807_s2 + $0x50] sm:$0xff] %v914_v51  ;;  %v912_v15 = vadd.f32 %v896_v18, %v1585_v24  ;;  %v899_v6 = vmul.f32 %v1197_v43, %v883_v52  ;;  %v881_v42 = vadd.f32 %v1774_v2, %v861_v23  ;;  %v866_v58 = vmul.f32 %v1205_v53, %v1768_v37 }
 0x131   : > { %v1209_v8 = vpop.eup %1208  ;;  %920 = vst [vmem:[%s1807_s2] sm:$0xff] %v904_v13  ;;  %v907_v28 = vadd.f32 %v891_v27, %v1647_v26  ;;  %v889_v16 = vmul.f32 %v1199_v56, %v873_v22  ;;  %v878_v12 = vadd.f32 %v1774_v2, %v858_v48  ;;  %v856_v1 = vmul.f32 %v1207_v54, %v1768_v37 }
 0x132   : > { %v1211_v14 = vpop.eup %1210  ;;  %928 = vst [vmem:[%s1807_s2 + $0x40] sm:$0xff] %v912_v15  ;;  %v915_v24 = vadd.f32 %v899_v6, %v1649_v34  ;;  %v897_v62 = vmul.f32 %v1201_v4, %v881_v42  ;;  %v886_v29 = vadd.f32 %v1774_v2, %v866_v58  ;;  %v864_v57 = vmul.f32 %v1209_v8, %v1768_v37 }
 0x133   : > { %v1213_v3 = vpop.eup %1212  ;;  %923 = vst [vmem:[%s1807_s2 + $0x18] sm:$0xff] %v907_v28  ;;  %v905_v26 = vadd.f32 %v889_v16, %v1654_v45  ;;  %v894_v41 = vmul.f32 %v1203_v9, %v878_v12  ;;  %v876_v10 = vadd.f32 %v1774_v2, %v856_v1  ;;  %v859_v55 = vmul.f32 %v1211_v14, %v1768_v37 }
 0x134   : > { %v1215_v50 = vpop.eup %1214  ;;  %931 = vst [vmem:[%s1807_s2 + $0x58] sm:$0xff] %v915_v24  ;;  %v913_v34 = vadd.f32 %v897_v62, %v1659_v38  ;;  %v902_v21 = vmul.f32 %v1205_v53, %v886_v29  ;;  %v884_v17 = vadd.f32 %v1774_v2, %v864_v57  ;;  %v867_v32 = vmul.f32 %v1213_v3, %v1768_v37 }
 0x135   : > { %v1217_v46 = vpop.eup %1216  ;;  %921 = vst [vmem:[%s1807_s2 + $0x8] sm:$0xff] %v905_v26  ;;  %v910_v45 = vadd.f32 %v894_v41, %v1731_v60  ;;  %v892_v59 = vmul.f32 %v1207_v54, %v876_v10  ;;  %v879_v43 = vadd.f32 %v1774_v2, %v859_v55  ;;  %v857_v61 = vmul.f32 %v1215_v50, %v1768_v37 }
 0x136   : > { %929 = vst [vmem:[%s1807_s2 + $0x48] sm:$0xff] %v913_v34  ;;  %v918_v31 = vadd.f32 %v902_v21, %v1738_v5  ;;  %v900_v38 = vmul.f32 %v1209_v8, %v884_v17  ;;  %v887_v47 = vadd.f32 %v1774_v2, %v867_v32  ;;  %v865_v56 = vmul.f32 %v1217_v46, %v1768_v37 }
 0x137   : > { %926 = vst [vmem:[%s1807_s2 + $0x30] sm:$0xff] %v910_v45  ;;  %v908_v40 = vadd.f32 %v892_v59, %v1759_v0  ;;  %v895_v60 = vmul.f32 %v1211_v14, %v879_v43  ;;  %v835_v25 = vadd.f32 %v1795_v20, %v1790_v30  ;;  %v877_v39 = vadd.f32 %v1774_v2, %v857_v61 }
 0x138   : > { %934 = vst [vmem:[%s1807_s2 + $0x70] sm:$0xff] %v918_v31  ;;  %v916_v5 = vadd.f32 %v900_v38, %v1781_v44  ;;  %v903_v4 = vmul.f32 %v1213_v3, %v887_v47  ;;  %v843_v37 = vadd.f32 %v1812_v11, %v1798_v36  ;;  %v885_v7 = vadd.f32 %v1774_v2, %v865_v56 }
 0x139   : > { %924 = vst [vmem:[%s1807_s2 + $0x20] sm:$0xff] %v908_v40  ;;  %v911_v0 = vadd.f32 %v895_v60, %v1787_v35  ;;  %v893_v63 = vmul.f32 %v1215_v50, %v877_v39 }
 0x13a   : > { %932 = vst [vmem:[%s1807_s2 + $0x60] sm:$0xff] %v916_v5  ;;  %v919_v30 = vadd.f32 %v903_v4, %v1802_v33  ;;  %v901_v20 = vmul.f32 %v1217_v46, %v885_v7 }
 0x13b   : > { %927 = vst [vmem:[%s1807_s2 + $0x38] sm:$0xff] %v911_v0  ;;  %v909_v49 = vadd.f32 %v893_v63, %v835_v25 }
 0x13c   : > { %935 = vst [vmem:[%s1807_s2 + $0x78] sm:$0xff] %v919_v30  ;;  %v917_v19 = vadd.f32 %v901_v20, %v843_v37 }
 0x13d   : > { %925 = vst [vmem:[%s1807_s2 + $0x28] sm:$0xff] %v909_v49 }
 0x13e   : > { %933 = vst [vmem:[%s1807_s2 + $0x68] sm:$0xff] %v917_v19 }
 0x13f PF: > { %s35_s3 = sadd.s32 1, %s1274_s3  }
 0x140   : > { %p32_p12 = scmp.ge.s32.totalorder %s35_s3, 8  }
 0x142   :  { %34 = sbr.rel (!%p32_p12) target bundleno = 47 (0x2f), region = 68 }

</bundles_post_ra>
